<compile_context>
chip_gen: v6e
topology: v6e:2x2x1
jax: 0.10.0
libtpu: 0.0.40
codegen_flags: <defaults>
</compile_context>

<pallas_src>
import jax
import jax.numpy as jnp
from jax.experimental import pallas as pl
from jax.experimental.pallas import tpu as pltpu


def _round_up(n, m):
    return (n + m - 1) // m * m


def _cdiv(a, b):
    return (a + b - 1) // b


def nbeats_block_kernel(x_ref, w1_ref, b1_ref, w2_ref, b2_ref,
                        w3_ref, b3_ref, w4_ref, b4_ref, out_ref):
    # x arrives fp32; cast to bf16 right before the MXU (cast hides under matmul).
    x = x_ref[...].astype(jnp.bfloat16)
    h = jnp.dot(x, w1_ref[...], preferred_element_type=jnp.float32) + b1_ref[...]
    h = jnp.maximum(h, 0.0)
    h = jnp.dot(h.astype(jnp.bfloat16), w2_ref[...],
                preferred_element_type=jnp.float32) + b2_ref[...]
    h = jnp.maximum(h, 0.0)
    h = jnp.dot(h.astype(jnp.bfloat16), w3_ref[...],
                preferred_element_type=jnp.float32) + b3_ref[...]
    h = jnp.maximum(h, 0.0)
    out = jnp.dot(h.astype(jnp.bfloat16), w4_ref[...],
                  preferred_element_type=jnp.float32) + b4_ref[...]
    out_ref[...] = out.astype(out_ref.dtype)      # lane-dense (TB, out_pad) store


def prepare_params(params, n_ahead, output_size):
    """One-time preprocessing (call at init, not per forward).

    - zero-pads the hidden dimension of w1..w4 / b1..b3 to a multiple of 128
      (exact through ReLU: padded activations are exactly 0),
    - zero-pads fc4 columns to a multiple of 128 (lane-dense output store),
    - casts all weight matrices to bf16 (biases stay fp32).
    """
    w1, b1, w2, b2, w3, b3, w4, b4 = params       # weights stored (in, out), fp32
    input_size, hidden = w1.shape
    out_dim = output_size * n_ahead
    hid_pad = _round_up(hidden, 128)
    out_pad = _round_up(out_dim, 128)

    def pad2(a, rows, cols):
        return jnp.pad(a, ((0, rows - a.shape[0]), (0, cols - a.shape[1])))

    bf = jnp.bfloat16
    w1p = pad2(w1, input_size, hid_pad).astype(bf)
    b1p = pad2(b1, 1, hid_pad)
    w2p = pad2(w2, hid_pad, hid_pad).astype(bf)
    b2p = pad2(b2, 1, hid_pad)
    w3p = pad2(w3, hid_pad, hid_pad).astype(bf)
    b3p = pad2(b3, 1, hid_pad)
    w4p = pad2(w4, hid_pad, out_pad).astype(bf)
    b4p = pad2(b4, 1, out_pad)
    return (w1p, b1p, w2p, b2p, w3p, b3p, w4p, b4p)


def nbeats_block(x, prepped, n_ahead, output_size, *, block_batch=None):
    """x: (batch, input_size) float32, prepped = prepare_params(...).

    Returns (batch, n_ahead, output_size) float32.
    """
    w1b, b1, w2b, b2, w3b, b3, w4b, b4 = prepped
    batch, input_size = x.shape
    assert w1b.shape[0] == input_size
    hid_pad = w1b.shape[1]
    out_pad = w4b.shape[1]
    out_dim = output_size * n_ahead

    # ---- batch tile selection ------------------------------------------------
    weight_bytes = sum(int(a.size) * a.dtype.itemsize for a in prepped)
    budget = 40 * 1024 * 1024                     # headroom under the 48 MiB limit

    def tile_bytes(t):
        x_t = t * input_size * 4                  # fp32 x tile
        o_t = t * out_pad * 4                     # fp32 out tile
        h_t = t * hid_pad * 4                     # fp32 intermediates (rough)
        return 2 * (x_t + o_t) + 4 * h_t          # double-buffered IO + activations

    if block_batch is None:
        tb_max = 1024                             # big tiles amortize ~0.35us/step
    else:
        tb_max = max(8, _round_up(block_batch, 8))
    # Honest VMEM check: resident weights are double-buffered by Pallas (x2).
    while tb_max > 8 and 2 * weight_bytes + tile_bytes(tb_max) > budget:
        tb_max = _round_up(max(8, tb_max // 2), 8)

    num_tiles = _cdiv(batch, tb_max)
    # v7x megacore: make sure the "parallel" batch axis has >= 2 tiles so both
    # TensorCores get work (skip for tiny batches where padding would dominate).
    if num_tiles == 1 and batch >= 16:
        num_tiles = 2
    # Minimize padding: tb just big enough to cover batch in num_tiles tiles.
    tb = _round_up(_cdiv(batch, num_tiles), 8)
    padded_batch = num_tiles * tb

    xp = x if padded_batch == batch else jnp.pad(x, ((0, padded_batch - batch), (0, 0)))

    def resident(shape):
        # Constant index_map -> block never changes -> weights stay VMEM-resident.
        return pl.BlockSpec(shape, lambda i: (0, 0))

    flat = pl.pallas_call(
        nbeats_block_kernel,
        out_shape=jax.ShapeDtypeStruct((padded_batch, out_pad), jnp.float32),
        grid=(num_tiles,),
        in_specs=[
            pl.BlockSpec((tb, input_size), lambda i: (i, 0)),   # x: streamed per tile
            resident(w1b.shape), resident(b1.shape),
            resident(w2b.shape), resident(b2.shape),
            resident(w3b.shape), resident(b3.shape),
            resident(w4b.shape), resident(b4.shape),
        ],
        out_specs=pl.BlockSpec((tb, out_pad), lambda i: (i, 0)),
        compiler_params=pltpu.CompilerParams(
            dimension_semantics=("parallel",),    # shard batch tiles across TCs (v7x)
            vmem_limit_bytes=48 * 1024 * 1024,    # safe under v7x's 64 MiB physical
        ),
    )(xp, w1b, b1, w2b, b2, w3b, b3, w4b, b4)

    out = flat[:batch, :out_dim]
    # Matches torch `out.view(-1, n_ahead, output_size)` (row-major reshape).
    return out.reshape(batch, n_ahead, output_size)


def init_params(key, input_size, hidden_dim, output_size, n_ahead):
    """Deterministic synthetic init. Weights stored as (in, out), fp32."""
    ks = jax.random.split(key, 8)

    def lin(kw, kb, fan_in, fan_out):
        bound = 1.0 / jnp.sqrt(fan_in)
        w = jax.random.uniform(kw, (fan_in, fan_out), jnp.float32, -bound, bound)
        b = jax.random.uniform(kb, (1, fan_out), jnp.float32, -bound, bound)
        return w, b

    w1, b1 = lin(ks[0], ks[1], input_size, hidden_dim)
    w2, b2 = lin(ks[2], ks[3], hidden_dim, hidden_dim)
    w3, b3 = lin(ks[4], ks[5], hidden_dim, hidden_dim)
    w4, b4 = lin(ks[6], ks[7], hidden_dim, output_size * n_ahead)
    return (w1, b1, w2, b2, w3, b3, w4, b4)


def ref_forward_bf16(x, params, n_ahead, output_size):
    """Pure-JAX reference emulating the kernel's bf16-matmul / fp32-accum math."""
    w1, b1, w2, b2, w3, b3, w4, b4 = params
    bf = jnp.bfloat16
    h = jnp.maximum(jnp.dot(x.astype(bf), w1.astype(bf),
                            preferred_element_type=jnp.float32) + b1, 0.0)
    h = jnp.maximum(jnp.dot(h.astype(bf), w2.astype(bf),
                            preferred_element_type=jnp.float32) + b2, 0.0)
    h = jnp.maximum(jnp.dot(h.astype(bf), w3.astype(bf),
                            preferred_element_type=jnp.float32) + b3, 0.0)
    out = jnp.dot(h.astype(bf), w4.astype(bf),
                  preferred_element_type=jnp.float32) + b4
    return out.reshape(-1, n_ahead, output_size)


if __name__ == "__main__":
    input_size, hidden_dim, output_size, n_ahead = 16, 32, 4, 8
    batch = 8

    key = jax.random.PRNGKey(0)
    kx, kp = jax.random.split(key)
    x = jax.random.normal(kx, (batch, input_size), jnp.float32)
    params = init_params(kp, input_size, hidden_dim, output_size, n_ahead)

    # One-time parameter preprocessing (bf16 cast + zero padding), reused across calls.
    prepped = jax.tree_util.tree_map(jax.block_until_ready,
                                     prepare_params(params, n_ahead, output_size))

    out = nbeats_block(x, prepped, n_ahead, output_size)
    out = jax.block_until_ready(out)

    ref = ref_forward_bf16(x, params, n_ahead, output_size)
    assert out.shape == (batch, n_ahead, output_size)
    assert jnp.allclose(out, ref, atol=1e-2, rtol=1e-2)

    print("KERNEL_OK")
</pallas_src>

<mosaic_0001>
module attributes {stable_mosaic.version = 11 : i64} {
  func.func @nbeats_block_kernel(%arg0: i32, %arg1: memref<8x16xf32, #tpu.memory_space<vmem>>, %arg2: memref<16x128xbf16, #tpu.memory_space<vmem>>, %arg3: memref<1x128xf32, #tpu.memory_space<vmem>>, %arg4: memref<128x128xbf16, #tpu.memory_space<vmem>>, %arg5: memref<1x128xf32, #tpu.memory_space<vmem>>, %arg6: memref<128x128xbf16, #tpu.memory_space<vmem>>, %arg7: memref<1x128xf32, #tpu.memory_space<vmem>>, %arg8: memref<128x128xbf16, #tpu.memory_space<vmem>>, %arg9: memref<1x128xf32, #tpu.memory_space<vmem>>, %arg10: memref<8x128xf32, #tpu.memory_space<vmem>>) attributes {dimension_semantics = [#tpu.dimension_semantics<parallel>], iteration_bounds = array<i64: 1>, scalar_prefetch = 0 : i64, scratch_operands = 0 : i64, tpu.core_type = #tpu.core_type<tc>, window_params = [{transform_indices = @transform_0, window_bounds = array<i64: 8, 16>}, {pipeline_mode = #tpu.pipeline_mode<synchronous>, transform_indices = @transform_1, window_bounds = array<i64: 16, 128>}, {pipeline_mode = #tpu.pipeline_mode<synchronous>, transform_indices = @transform_2, window_bounds = array<i64: 1, 128>}, {pipeline_mode = #tpu.pipeline_mode<synchronous>, transform_indices = @transform_3, window_bounds = array<i64: 128, 128>}, {pipeline_mode = #tpu.pipeline_mode<synchronous>, transform_indices = @transform_4, window_bounds = array<i64: 1, 128>}, {pipeline_mode = #tpu.pipeline_mode<synchronous>, transform_indices = @transform_5, window_bounds = array<i64: 128, 128>}, {pipeline_mode = #tpu.pipeline_mode<synchronous>, transform_indices = @transform_6, window_bounds = array<i64: 1, 128>}, {pipeline_mode = #tpu.pipeline_mode<synchronous>, transform_indices = @transform_7, window_bounds = array<i64: 128, 128>}, {pipeline_mode = #tpu.pipeline_mode<synchronous>, transform_indices = @transform_8, window_bounds = array<i64: 1, 128>}, {transform_indices = @transform_9, window_bounds = array<i64: 8, 128>}]} {
    %c0 = arith.constant 0 : index
    %c0_0 = arith.constant 0 : index
    %0 = vector.load %arg1[%c0, %c0_0] : memref<8x16xf32, #tpu.memory_space<vmem>>, vector<8x16xf32>
    %1 = arith.truncf %0 : vector<8x16xf32> to vector<8x16xbf16>
    %c0_1 = arith.constant 0 : index
    %c0_2 = arith.constant 0 : index
    %2 = vector.load %arg2[%c0_1, %c0_2] : memref<16x128xbf16, #tpu.memory_space<vmem>>, vector<16x128xbf16>
    %cst = arith.constant dense<0.000000e+00> : vector<8x128xf32>
    %3 = tpu.matmul %1, %2, %cst {dimension_numbers = #tpu.dot_dimension_numbers<[1], [0], [0], [1], [0, 0, 1, 1], [], []>} : vector<8x16xbf16>, vector<16x128xbf16>, vector<8x128xf32> -> vector<8x128xf32>
    %c0_3 = arith.constant 0 : index
    %c0_4 = arith.constant 0 : index
    %4 = vector.load %arg3[%c0_3, %c0_4] : memref<1x128xf32, #tpu.memory_space<vmem>>, vector<1x128xf32>
    %5 = vector.broadcast %4 : vector<1x128xf32> to vector<8x128xf32>
    %6 = arith.addf %3, %5 : vector<8x128xf32>
    %cst_5 = arith.constant 0.000000e+00 : f32
    %7 = vector.broadcast %cst_5 : f32 to vector<8x128xf32>
    %8 = arith.maximumf %6, %7 : vector<8x128xf32>
    %9 = arith.truncf %8 : vector<8x128xf32> to vector<8x128xbf16>
    %c0_6 = arith.constant 0 : index
    %c0_7 = arith.constant 0 : index
    %10 = vector.load %arg4[%c0_6, %c0_7] : memref<128x128xbf16, #tpu.memory_space<vmem>>, vector<128x128xbf16>
    %cst_8 = arith.constant dense<0.000000e+00> : vector<8x128xf32>
    %11 = tpu.matmul %9, %10, %cst_8 {dimension_numbers = #tpu.dot_dimension_numbers<[1], [0], [0], [1], [0, 0, 1, 1], [], []>} : vector<8x128xbf16>, vector<128x128xbf16>, vector<8x128xf32> -> vector<8x128xf32>
    %c0_9 = arith.constant 0 : index
    %c0_10 = arith.constant 0 : index
    %12 = vector.load %arg5[%c0_9, %c0_10] : memref<1x128xf32, #tpu.memory_space<vmem>>, vector<1x128xf32>
    %13 = vector.broadcast %12 : vector<1x128xf32> to vector<8x128xf32>
    %14 = arith.addf %11, %13 : vector<8x128xf32>
    %cst_11 = arith.constant 0.000000e+00 : f32
    %15 = vector.broadcast %cst_11 : f32 to vector<8x128xf32>
    %16 = arith.maximumf %14, %15 : vector<8x128xf32>
    %17 = arith.truncf %16 : vector<8x128xf32> to vector<8x128xbf16>
    %c0_12 = arith.constant 0 : index
    %c0_13 = arith.constant 0 : index
    %18 = vector.load %arg6[%c0_12, %c0_13] : memref<128x128xbf16, #tpu.memory_space<vmem>>, vector<128x128xbf16>
    %cst_14 = arith.constant dense<0.000000e+00> : vector<8x128xf32>
    %19 = tpu.matmul %17, %18, %cst_14 {dimension_numbers = #tpu.dot_dimension_numbers<[1], [0], [0], [1], [0, 0, 1, 1], [], []>} : vector<8x128xbf16>, vector<128x128xbf16>, vector<8x128xf32> -> vector<8x128xf32>
    %c0_15 = arith.constant 0 : index
    %c0_16 = arith.constant 0 : index
    %20 = vector.load %arg7[%c0_15, %c0_16] : memref<1x128xf32, #tpu.memory_space<vmem>>, vector<1x128xf32>
    %21 = vector.broadcast %20 : vector<1x128xf32> to vector<8x128xf32>
    %22 = arith.addf %19, %21 : vector<8x128xf32>
    %cst_17 = arith.constant 0.000000e+00 : f32
    %23 = vector.broadcast %cst_17 : f32 to vector<8x128xf32>
    %24 = arith.maximumf %22, %23 : vector<8x128xf32>
    %25 = arith.truncf %24 : vector<8x128xf32> to vector<8x128xbf16>
    %c0_18 = arith.constant 0 : index
    %c0_19 = arith.constant 0 : index
    %26 = vector.load %arg8[%c0_18, %c0_19] : memref<128x128xbf16, #tpu.memory_space<vmem>>, vector<128x128xbf16>
    %cst_20 = arith.constant dense<0.000000e+00> : vector<8x128xf32>
    %27 = tpu.matmul %25, %26, %cst_20 {dimension_numbers = #tpu.dot_dimension_numbers<[1], [0], [0], [1], [0, 0, 1, 1], [], []>} : vector<8x128xbf16>, vector<128x128xbf16>, vector<8x128xf32> -> vector<8x128xf32>
    %c0_21 = arith.constant 0 : index
    %c0_22 = arith.constant 0 : index
    %28 = vector.load %arg9[%c0_21, %c0_22] : memref<1x128xf32, #tpu.memory_space<vmem>>, vector<1x128xf32>
    %29 = vector.broadcast %28 : vector<1x128xf32> to vector<8x128xf32>
    %30 = arith.addf %27, %29 : vector<8x128xf32>
    %c0_23 = arith.constant 0 : index
    %c0_24 = arith.constant 0 : index
    %31 = vector.load %arg10[%c0_23, %c0_24] : memref<8x128xf32, #tpu.memory_space<vmem>>, vector<8x128xf32>
    tpu.vector_store %arg10[%c0_23, %c0_24], %30 {strides = array<i32>} : memref<8x128xf32, #tpu.memory_space<vmem>>, vector<8x128xf32>,
    return
  }
  func.func @transform_0(%arg0: i32) -> (i32, i32) {
    %c0_i32 = arith.constant 0 : i32
    %c0_i32_0 = arith.constant 0 : i32
    return %arg0, %c0_i32 : i32, i32
  }
  func.func @transform_1(%arg0: i32) -> (i32, i32) {
    %c0_i32 = arith.constant 0 : i32
    %c0_i32_0 = arith.constant 0 : i32
    %c0_i32_1 = arith.constant 0 : i32
    return %c0_i32, %c0_i32_0 : i32, i32
  }
  func.func @transform_2(%arg0: i32) -> (i32, i32) {
    %c0_i32 = arith.constant 0 : i32
    %c0_i32_0 = arith.constant 0 : i32
    %c0_i32_1 = arith.constant 0 : i32
    return %c0_i32, %c0_i32_0 : i32, i32
  }
  func.func @transform_3(%arg0: i32) -> (i32, i32) {
    %c0_i32 = arith.constant 0 : i32
    %c0_i32_0 = arith.constant 0 : i32
    %c0_i32_1 = arith.constant 0 : i32
    return %c0_i32, %c0_i32_0 : i32, i32
  }
  func.func @transform_4(%arg0: i32) -> (i32, i32) {
    %c0_i32 = arith.constant 0 : i32
    %c0_i32_0 = arith.constant 0 : i32
    %c0_i32_1 = arith.constant 0 : i32
    return %c0_i32, %c0_i32_0 : i32, i32
  }
  func.func @transform_5(%arg0: i32) -> (i32, i32) {
    %c0_i32 = arith.constant 0 : i32
    %c0_i32_0 = arith.constant 0 : i32
    %c0_i32_1 = arith.constant 0 : i32
    return %c0_i32, %c0_i32_0 : i32, i32
  }
  func.func @transform_6(%arg0: i32) -> (i32, i32) {
    %c0_i32 = arith.constant 0 : i32
    %c0_i32_0 = arith.constant 0 : i32
    %c0_i32_1 = arith.constant 0 : i32
    return %c0_i32, %c0_i32_0 : i32, i32
  }
  func.func @transform_7(%arg0: i32) -> (i32, i32) {
    %c0_i32 = arith.constant 0 : i32
    %c0_i32_0 = arith.constant 0 : i32
    %c0_i32_1 = arith.constant 0 : i32
    return %c0_i32, %c0_i32_0 : i32, i32
  }
  func.func @transform_8(%arg0: i32) -> (i32, i32) {
    %c0_i32 = arith.constant 0 : i32
    %c0_i32_0 = arith.constant 0 : i32
    %c0_i32_1 = arith.constant 0 : i32
    return %c0_i32, %c0_i32_0 : i32, i32
  }
  func.func @transform_9(%arg0: i32) -> (i32, i32) {
    %c0_i32 = arith.constant 0 : i32
    %c0_i32_0 = arith.constant 0 : i32
    return %arg0, %c0_i32 : i32, i32
  }
}

</mosaic_0001>

<bundles_post_ra>
// kernel: tpu_custom_call.1
= control target key start
LH: loop header
LB: loop body
LE: loop exit
PB: predicated region body
PF: predicated region fallthrough
CT: control target
= control target key end

     0   :  { %14 = vsyncpa [#allocation3], 0  ;;  %s941_s0 = inlined_call_operand.hbm [shape: f32[8,16], index: 0, kind: input, shape index: {}]   ;;  %s942_s1 = inlined_call_operand.hbm [shape: bf16[16,128], index: 1, kind: input, shape index: {}]   ;;  %s943_s2 = inlined_call_operand.vmem [shape: f32[1,128], index: 2, kind: input, shape index: {}]   ;;  %s944_s3 = inlined_call_operand.hbm [shape: bf16[128,128], index: 3, kind: input, shape index: {}]   ;;  %s945_s4 = inlined_call_operand.vmem [shape: f32[1,128], index: 4, kind: input, shape index: {}]   ;;  %s946_s5 = inlined_call_operand.hbm [shape: bf16[128,128], index: 5, kind: input, shape index: {}]   ;;  %s947_s6 = inlined_call_operand.vmem [shape: f32[1,128], index: 6, kind: input, shape index: {}]   ;;  %s948_s7 = inlined_call_operand.hbm [shape: bf16[128,128], index: 7, kind: input, shape index: {}]   ;;  %s949_s8 = inlined_call_operand.vmem [shape: f32[1,128], index: 8, kind: input, shape index: {}]   ;;  %s950_s9 = inlined_call_operand.hbm [shape: f32[8,128], index: 9, kind: output, shape index: {}]  }
   0x1   :  { %15 = vsyncpa [#allocation6], 0 }
   0x2   :  { %16 = vsyncpa [#allocation9], 0 }
   0x3   :  { %17 = vsyncpa [#allocation4], 0  ;;  %s806_s30 = smov [#allocation5]  }
   0x4   :  { %s33_s10 = sshll.u32 %s806_s30, 4  ;;  %s34_s10 = int_to_ptr.vmem [resolvable:$true] %s33_s10 }
   0x5   :  { %s686_s11 = scalar_lea.vmem %s34_s10, 128  ;;  %p691_p1 = scmp.lt.s32.totalorder %s34_s10, %s34_s10 }
   0x6   :  { %p687_p0 = scmp.ne.s32.totalorder %s34_s10, %s686_s11  ;;  %p692_p2 = scmp.lt.s32.totalorder %s686_s11, %s686_s11 }
   0x8   :  { %p693_p3 = por %p692_p2, %p691_p1 }
   0xa   :  { %p694_p4 = pnand %p693_p3, %p687_p0 }
   0xc   :  { %697 = shalt.err (!%p694_p4)
}
   0xd   :  { %s807_s12 = smov 64   ;;  %s808_s13 = smov 4  }
   0xe   :  { %39 = dma.hbm_to_vmem [thread:$0]  %s942_s1, 128, %s34_s10, [#allocation6], %s807_s12, %s807_s12, %s808_s13  }
   0xf   :  { %s809_s16 = smov [#allocation8]   ;;  %s810_s18 = smov [#allocation2]  }
  0x10   :  { %s61_s17 = sshll.u32 %s809_s16, 4  ;;  %s24_s19 = sshll.u32 %s810_s18, 4  ;;  %s62_s17 = int_to_ptr.vmem [resolvable:$true] %s61_s17  ;;  %s25_s19 = int_to_ptr.vmem [resolvable:$true] %s24_s19 }
  0x11   :  { %s706_s20 = scalar_lea.vmem %s62_s17, 1024  ;;  %p711_p6 = scmp.lt.s32.totalorder %s62_s17, %s62_s17 }
  0x12   :  { %p707_p5 = scmp.ne.s32.totalorder %s62_s17, %s706_s20  ;;  %p712_p7 = scmp.lt.s32.totalorder %s706_s20, %s706_s20 }
  0x14   :  { %p713_p8 = por %p712_p7, %p711_p6 }
  0x16   :  { %p714_p9 = pnand %p713_p8, %p707_p5 }
  0x18   :  { %717 = shalt.err (!%p714_p9)
}
  0x19   :  { %67 = dma.hbm_to_vmem [thread:$0]  %s946_s5, 1024, %s62_s17, [#allocation9], %s807_s12, %s807_s12, %s808_s13  }
  0x1a   :  { %s726_s1 = scalar_lea.vmem %s25_s19, 128  ;;  %p731_p11 = scmp.lt.s32.totalorder %s25_s19, %s25_s19 }
  0x1b   :  { %p727_p10 = scmp.ne.s32.totalorder %s25_s19, %s726_s1  ;;  %p732_p12 = scmp.lt.s32.totalorder %s726_s1, %s726_s1 }
  0x1d   :  { %p733_p13 = por %p732_p12, %p731_p11 }
  0x1f   :  { %p734_p0 = pnand %p733_p13, %p727_p10 }
  0x21   :  { %737 = shalt.err (!%p734_p0)
}
  0x22   :  { %27 = dma.hbm_to_vmem [thread:$0]  %s941_s0, 128, %s25_s19, [#allocation3]  }
  0x23   :  { %s811_s25 = smov [#allocation7]   ;;  %s812_s27 = smov [#allocation10]  }
  0x24   :  { %s47_s26 = sshll.u32 %s811_s25, 4  ;;  %s75_s28 = sshll.u32 %s812_s27, 4  ;;  %s48_s26 = int_to_ptr.vmem [resolvable:$true] %s47_s26  ;;  %s76_s28 = int_to_ptr.vmem [resolvable:$true] %s75_s28 }
  0x25   :  { %s746_s29 = scalar_lea.vmem %s48_s26, 1024  ;;  %p751_p2 = scmp.lt.s32.totalorder %s48_s26, %s48_s26 }
  0x26   :  { %p747_p1 = scmp.ne.s32.totalorder %s48_s26, %s746_s29  ;;  %p752_p3 = scmp.lt.s32.totalorder %s746_s29, %s746_s29 }
  0x28   :  { %p753_p4 = por %p752_p3, %p751_p2 }
  0x2a   :  { %p754_p5 = pnand %p753_p4, %p747_p1 }
  0x2c   :  { %757 = shalt.err (!%p754_p5)
}
  0x2d   :  { %53 = dma.hbm_to_vmem [thread:$0]  %s944_s3, 1024, %s48_s26, [#allocation6], %s807_s12, %s807_s12, %s808_s13  }
  0x2e   :  { %s766_s0 = scalar_lea.vmem %s76_s28, 1024  ;;  %p771_p7 = scmp.lt.s32.totalorder %s76_s28, %s76_s28 }
  0x2f   :  { %p767_p6 = scmp.ne.s32.totalorder %s76_s28, %s766_s0  ;;  %p772_p8 = scmp.lt.s32.totalorder %s766_s0, %s766_s0 }
  0x31   :  { %p773_p9 = por %p772_p8, %p771_p7 }
  0x33   :  { %p774_p10 = pnand %p773_p9, %p767_p6 }
  0x35   :  { %777 = shalt.err (!%p774_p10)
}
  0x36   :  { %81 = dma.hbm_to_vmem [thread:$0]  %s948_s7, 1024, %s76_s28, [#allocation9], %s807_s12, %s807_s12, %s808_s13  }
  0x37   :  { %798 = dma.done.wait [#allocation3], 128  }
  0x38   :  { %799 = vsyncadd [#allocation3], 4294967168 }
  0x39   :  { %800 = dma.done.wait [#allocation6], 1152  }
  0x3a   :  { %801 = vsyncadd [#allocation6], 4294966144 }
  0x3b   :  { %802 = dma.done.wait [#allocation9], 2048  }
  0x3c   :  { %803 = vsyncadd [#allocation9], 4294965248  ;;  %v813_v0 = vmov 0.0   ;;  %vm814_vm0 = vmmov 0   ;;  %v653_v1 = vld [vmem:[#allocation5] sm:$0xff]   ;;  %v100_v2 = vld [vmem:[#allocation2] sm:$0xff] }
  0x3d   :  { %577 = vmatprep.subr.bf16.mxu0 %v813_v0  ;;  %579 = vmatprep.mubr.msk.bf16.mxu0 %vm814_vm0, %v813_v0  ;;  %v101_v3 = vpack.c.bf16 %v100_v2, %v100_v2  ;;  %vm117_vm1 = vcmask 130048   ;;  %v654_v4 = vld [vmem:[#allocation7 + $0x38] sm:$0xff]   ;;  %v655_v5 = vld [vmem:[#allocation7 + $0x30] sm:$0xff]   ;;  %v656_v6 = vld [vmem:[#allocation7 + $0x28] sm:$0xff]   ;;  %s815_s16 = smov [#allocation11]  }
  0x3e   :  { %583 = vmatprep.subr.bf16.mxu1 %v813_v0  ;;  %599 = vmatprep.mubr.msk.bf16.mxu1 %vm814_vm0, %v813_v0  ;;  %v657_v7 = vld [vmem:[#allocation7 + $0x20] sm:$0xff]   ;;  %v658_v8 = vld [vmem:[#allocation7 + $0x18] sm:$0xff]   ;;  %v659_v9 = vld [vmem:[#allocation7 + $0x10] sm:$0xff]   ;;  %s507_s17 = sshll.u32 %s815_s16, 4  ;;  %s508_s17 = int_to_ptr.vmem [resolvable:$true] %s507_s17 }
  0x3f   :  { %578 = vmatpush3.bf16.msra.mxu0 %v653_v1  ;;  %584 = vmatpush3.bf16.msra.mxu1 %v654_v4  ;;  %v660_v10 = vld [vmem:[#allocation7 + $0x8] sm:$0xff]   ;;  %v661_v11 = vld [vmem:[#allocation7] sm:$0xff]   ;;  %v662_v12 = vld [vmem:[#allocation8 + $0x38] sm:$0xff]   ;;  %p783_p12 = scmp.lt.s32.totalorder %s508_s17, %s508_s17 }
  0x40   :  { %603 = vmatprep.subr.bf16.mxu0 %v813_v0  ;;  %585 = vmatprep.subr.bf16.mxu1 %v813_v0  ;;  %v663_v13 = vld [vmem:[#allocation8 + $0x30] sm:$0xff]   ;;  %v664_v14 = vld [vmem:[#allocation8 + $0x28] sm:$0xff]   ;;  %v665_v15 = vld [vmem:[#allocation8 + $0x20] sm:$0xff]  }
  0x41   :  { %v666_v16 = vld [vmem:[#allocation8 + $0x18] sm:$0xff]   ;;  %v667_v17 = vld [vmem:[#allocation8 + $0x10] sm:$0xff]   ;;  %v668_v26 = vld [vmem:[#allocation8 + $0x8] sm:$0xff]  }
  0x42   :  { %580 = vmatmul.mubr.msk.bf16.vlgmr.msra.gmra.mxu0 %vm117_vm1, %v101_v3  ;;  %v518_v18 = vld [vmem:[%s943_s2] ss:$0 sm:$0xff]  ;;  %v669_v27 = vld [vmem:[#allocation8] sm:$0xff]   ;;  %v670_v28 = vld [vmem:[#allocation10 + $0x38] sm:$0xff]  }
  0x43   :  { %619 = vmatprep.mubr.msk.bf16.mxu0 %vm814_vm0, %v813_v0  ;;  %586 = vmatpush3.bf16.msra.mxu1 %v655_v5  ;;  %v671_v29 = vld [vmem:[#allocation10 + $0x30] sm:$0xff]   ;;  %v672_v30 = vld [vmem:[#allocation10 + $0x28] sm:$0xff]   ;;  %v673_v31 = vld [vmem:[#allocation10 + $0x20] sm:$0xff]  }
  0x44   :  { %587 = vmatprep.subr.bf16.mxu1 %v813_v0  ;;  %604 = vmatpush3.bf16.msra.mxu0 %v662_v12  ;;  %v674_v32 = vld [vmem:[#allocation10 + $0x18] sm:$0xff]   ;;  %v675_v33 = vld [vmem:[#allocation10 + $0x10] sm:$0xff]   ;;  %v676_v42 = vld [vmem:[#allocation10 + $0x8] sm:$0xff]  }
  0x45   :  { %605 = vmatprep.subr.bf16.mxu0 %v813_v0  ;;  %v521_v34 = vld [vmem:[%s945_s4] ss:$0 sm:$0xff]  ;;  %v677_v43 = vld [vmem:[#allocation10] sm:$0xff]  }
  0x46   :  { %v530_v44 = vld [vmem:[%s947_s6] ss:$0 sm:$0xff]  ;;  %s778_s6 = scalar_lea.vmem %s508_s17, 128 }
  0x47   :  { %588 = vmatpush3.bf16.msra.mxu1 %v656_v6  ;;  %v539_v52 = vld [vmem:[%s949_s8] ss:$0 sm:$0xff]  ;;  %p779_p11 = scmp.ne.s32.totalorder %s508_s17, %s778_s6  ;;  %p784_p13 = scmp.lt.s32.totalorder %s778_s6, %s778_s6 }
  0x48   :  { %589 = vmatprep.subr.bf16.mxu1 %v813_v0  ;;  %606 = vmatpush3.bf16.msra.mxu0 %v663_v13 }
  0x49   :  { %607 = vmatprep.subr.bf16.mxu0 %v813_v0  ;;  %p785_p0 = por %p784_p13, %p783_p12 }
  0x4b   :  { %590 = vmatpush3.bf16.msra.mxu1 %v657_v7  ;;  %p786_p1 = pnand %p785_p0, %p779_p11 }
  0x4c   :  { %591 = vmatprep.subr.bf16.mxu1 %v813_v0  ;;  %608 = vmatpush3.bf16.msra.mxu0 %v664_v14 }
  0x4d   :  { %609 = vmatprep.subr.bf16.mxu0 %v813_v0 }
  0x4f   :  { %592 = vmatpush3.bf16.msra.mxu1 %v658_v8 }
  0x50   :  { %593 = vmatprep.subr.bf16.mxu1 %v813_v0  ;;  %610 = vmatpush3.bf16.msra.mxu0 %v665_v15 }
  0x51   :  { %611 = vmatprep.subr.bf16.mxu0 %v813_v0 }
  0x53   :  { %594 = vmatpush3.bf16.msra.mxu1 %v659_v9 }
  0x54   :  { %595 = vmatprep.subr.bf16.mxu1 %v813_v0  ;;  %612 = vmatpush3.bf16.msra.mxu0 %v666_v16 }
  0x55   :  { %613 = vmatprep.subr.bf16.mxu0 %v813_v0 }
  0x57   :  { %596 = vmatpush3.bf16.msra.mxu1 %v660_v10 }
  0x58   :  { %597 = vmatprep.subr.bf16.mxu1 %v813_v0  ;;  %614 = vmatpush3.bf16.msra.mxu0 %v667_v17 }
  0x59   :  { %615 = vmatprep.subr.bf16.mxu0 %v813_v0 }
  0x5b   :  { %598 = vmatpush3.bf16.msra.mxu1 %v661_v11 }
  0x5c   :  { %623 = vmatprep.subr.bf16.mxu1 %v813_v0  ;;  %616 = vmatpush3.bf16.msra.mxu0 %v668_v26 }
  0x5d   :  { %617 = vmatprep.subr.bf16.mxu0 %v813_v0 }
  0x60   :  { %618 = vmatpush3.bf16.msra.mxu0 %v669_v27 }
 0x102   :  { %v155_v19 = vpop.f32.mrf.mxu0 }
 0x103   :  { %v156_v20 = vadd.f32 %v518_v18, %v155_v19 }
 0x104   :  { %v581_v21 = vpop.f32.mrf.mxu0 }
 0x105   :  { %v161_v22 = vmax.f32 %v156_v20, 0.0 }
 0x106   :  { %v158_v23 = vpop.f32.mrf.mxu0 }
 0x107   :  { %v162_v24 = vpack.c.bf16 %v161_v22, %v161_v22 }
 0x108   :  { %v582_v25 = vpop.f32.mrf.mxu0 }
 0x109   :  { %600 = vmatmul.mubr.bf16.vlgmr.msra.gmra.mxu1 %v162_v24 }
 0x10a   :  { %639 = vmatprep.mubr.msk.bf16.mxu1 %vm814_vm0, %v813_v0  ;;  %624 = vmatpush3.bf16.msra.mxu1 %v670_v28 }
 0x10b   :  { %625 = vmatprep.subr.bf16.mxu1 %v813_v0 }
 0x10e   :  { %626 = vmatpush3.bf16.msra.mxu1 %v671_v29 }
 0x10f   :  { %627 = vmatprep.subr.bf16.mxu1 %v813_v0 }
 0x112   :  { %628 = vmatpush3.bf16.msra.mxu1 %v672_v30 }
 0x113   :  { %629 = vmatprep.subr.bf16.mxu1 %v813_v0 }
 0x116   :  { %630 = vmatpush3.bf16.msra.mxu1 %v673_v31 }
 0x117   :  { %631 = vmatprep.subr.bf16.mxu1 %v813_v0 }
 0x11a   :  { %632 = vmatpush3.bf16.msra.mxu1 %v674_v32 }
 0x11b   :  { %633 = vmatprep.subr.bf16.mxu1 %v813_v0 }
 0x11e   :  { %634 = vmatpush3.bf16.msra.mxu1 %v675_v33 }
 0x11f   :  { %635 = vmatprep.subr.bf16.mxu1 %v813_v0 }
 0x122   :  { %636 = vmatpush3.bf16.msra.mxu1 %v676_v42 }
 0x123   :  { %637 = vmatprep.subr.bf16.mxu1 %v813_v0 }
 0x126   :  { %638 = vmatpush3.bf16.msra.mxu1 %v677_v43 }
 0x1c9   :  { %v268_v35 = vpop.f32.mrf.mxu1 }
 0x1ca   :  { %v269_v36 = vadd.f32 %v521_v34, %v268_v35 }
 0x1cb   :  { %v601_v37 = vpop.f32.mrf.mxu1 }
 0x1cc   :  { %v274_v38 = vmax.f32 %v269_v36, 0.0 }
 0x1cd   :  { %v271_v39 = vpop.f32.mrf.mxu1 }
 0x1ce   :  { %v275_v40 = vpack.c.bf16 %v274_v38, %v274_v38 }
 0x1cf   :  { %v602_v41 = vpop.f32.mrf.mxu1 }
 0x1d0   :  { %620 = vmatmul.mubr.bf16.vlgmr.msra.gmra.mxu0 %v275_v40 }
 0x290   :  { %v381_v45 = vpop.f32.mrf.mxu0 }
 0x291   :  { %v382_v46 = vadd.f32 %v530_v44, %v381_v45 }
 0x292   :  { %v621_v47 = vpop.f32.mrf.mxu0 }
 0x293   :  { %v387_v48 = vmax.f32 %v382_v46, 0.0 }
 0x294   :  { %v384_v49 = vpop.f32.mrf.mxu0 }
 0x295   :  { %v388_v50 = vpack.c.bf16 %v387_v48, %v387_v48 }
 0x296   :  { %v622_v51 = vpop.f32.mrf.mxu0 }
 0x297   :  { %640 = vmatmul.mubr.bf16.vlgmr.msra.gmra.mxu1 %v388_v50 }
 0x357   :  { %v494_v53 = vpop.f32.mrf.mxu1 }
 0x358   :  { %v495_v54 = vadd.f32 %v539_v52, %v494_v53 }
 0x359   :  { %v641_v55 = vpop.f32.mrf.mxu1 }
 0x35a   :  { %500 = vst [vmem:[#allocation11] sm:$0xff] %v495_v54 }
 0x35b   :  { %v497_v56 = vpop.f32.mrf.mxu1 }
 0x35c   :  { %789 = shalt.err (!%p786_p1)
}
 0x35d   :  { %510 = dma.vmem_to_hbm [thread:$0]  %s508_s17, 128, %s950_s9, [#allocation4]   ;;  %v642_v57 = vpop.f32.mrf.mxu1 }
 0x35e   :  { %804 = dma.done.wait [#allocation4], 128  }
 0x35f   :  { %805 = vsyncadd [#allocation4], 4294967168 }
 0x360   :  { %514 = vsyncpa [#allocation3], 1 }
 0x361   :  { %515 = vsyncpa [#allocation6], 1 }
 0x362   :  { %516 = vsyncpa [#allocation9], 1 }
 0x363   :  { %517 = vsyncpa [#allocation4], 1 }

</bundles_post_ra>
